<compile_context>
chip_gen: v7x
topology: tpu7x:2x2x1
jax: 0.10.0
libtpu: 0.0.40
codegen_flags: <defaults>
</compile_context>

<pallas_src>
import functools

import jax
import jax.numpy as jnp
from jax import lax
from jax.experimental import pallas as pl
from jax.experimental.pallas import tpu as pltpu


# ----------------------------------------------------------------------------
# Fused kernel: entire forward pass, everything VMEM-resident.
# ----------------------------------------------------------------------------
def fused_forward_kernel(x_ref, wih_ref, whh_ref, blstm_ref,
                         w1_ref, b1_ref, w2p_ref, wcp_ref, bh_ref, segmat_ref,
                         out_ref, *, T, Bp, H, n_prop, n_cls):
    """Shapes (all float32):
      x_ref      : (T*Bp, D)    time-major, batch padded to sublane multiple
      wih_ref    : (D, 4H)      gate order [i | f | o | g]   (pre-permuted)
      whh_ref    : (H, 4H)      gate order [i | f | o | g]
      blstm_ref  : (1, 4H)      b_ih + b_hh (permuted)
      w1_ref,b1  : (H, H),(1,H) proposal MLP layer 1
      w2p_ref    : (H, HEADW)   proposal output weights in cols [0, 3P)
      wcp_ref    : (H, HEADW)   classifier weights in cols [3P, 3P+PC)
      bh_ref     : (1, HEADW)   matching bias slab
      segmat_ref : (PC, PC)     block-diagonal ones (segment-sum for softmax)
      out_ref    : (Bp, HEADW)  cols [0,3P): proposals, [3P,3P+PC): class probs
    """
    # 1) Input projection for ALL timesteps at once (hoisted out of recurrence).
    xg = jnp.dot(x_ref[...], wih_ref[...],
                 preferred_element_type=jnp.float32) + blstm_ref[...]   # (T*Bp, 4H)

    whh = whh_ref[...]
    inv_T = jnp.float32(1.0 / T)

    h = jnp.zeros((Bp, H), jnp.float32)
    c = jnp.zeros((Bp, H), jnp.float32)
    hsum = jnp.zeros((Bp, H), jnp.float32)

    # 2) Recurrence, fully unrolled at trace time (T is small and static), so
    #    all slices are static and the LLO scheduler sees the whole window.
    for t in range(T):
        gates = xg[t * Bp:(t + 1) * Bp, :] + jnp.dot(
            h, whh, preferred_element_type=jnp.float32)                 # (Bp, 4H)
        sig = jax.nn.sigmoid(gates[:, 0:3 * H])      # one wide sigmoid: [i|f|o]
        g_g = jnp.tanh(gates[:, 3 * H:4 * H])
        i_g = sig[:, 0:H]
        f_g = sig[:, H:2 * H]
        o_g = sig[:, 2 * H:3 * H]
        c = f_g * c + i_g * g_g
        h = o_g * jnp.tanh(c)
        hsum = hsum + h

    avg = hsum * inv_T                                                  # (Bp, H)

    # 3) Heads fused into one lane-dense (Bp, HEADW) slab: proposal-head output
    #    and classifier land in disjoint column ranges of the same accumulator.
    z = jnp.maximum(
        jnp.dot(avg, w1_ref[...], preferred_element_type=jnp.float32) + b1_ref[...],
        0.0)
    headcat = (jnp.dot(z, w2p_ref[...], preferred_element_type=jnp.float32)
               + jnp.dot(avg, wcp_ref[...], preferred_element_type=jnp.float32)
               + bh_ref[...])                                           # (Bp, HEADW)

    # 4) Per-proposal softmax over C classes, kept 2D / lane-parallel:
    #    per-row max shift (constant within each class group => softmax
    #    invariant) + block-diagonal segment-sum matmul.
    scores = headcat[:, n_prop:n_prop + n_cls]                          # (Bp, P*C)
    m = jnp.max(scores, axis=-1, keepdims=True)
    e = jnp.exp(scores - m)
    ssum = jnp.dot(e, segmat_ref[...], preferred_element_type=jnp.float32)
    probs = e * pl.reciprocal(ssum)                                     # exact

    out_ref[...] = headcat                        # one dense 128-lane store
    out_ref[:, n_prop:n_prop + n_cls] = probs     # overwrite raw scores w/probs


# ----------------------------------------------------------------------------
# Wrapper
# ----------------------------------------------------------------------------
def temporal_action_forward(video, params, *, num_classes, max_proposals):
    B, T, D = video.shape
    H = params["w_hh"].shape[1]
    P, C = max_proposals, num_classes
    PC = P * C
    n_prop = 3 * P
    n_out = n_prop + PC

    Bp = ((B + 7) // 8) * 8                     # pad batch to sublane tile
    HEADW = ((n_out + 127) // 128) * 128        # lane-dense head output width
    f32 = jnp.float32

    # --- glue: one-time weight re-layouts (outside the kernel) ---
    # PyTorch LSTM gate order along 4H is [i, f, g, o]; permute to [i, f, o, g]
    # so one contiguous sigmoid covers 3H lanes in the kernel.
    perm = jnp.concatenate([jnp.arange(0, H), jnp.arange(H, 2 * H),
                            jnp.arange(3 * H, 4 * H), jnp.arange(2 * H, 3 * H)])
    wih_t = params["w_ih"].T[:, perm].astype(f32)                       # (D, 4H)
    whh_t = params["w_hh"].T[:, perm].astype(f32)                       # (H, 4H)
    b_lstm = (params["b_ih"] + params["b_hh"])[perm].reshape(1, 4 * H).astype(f32)

    # Time-major, batch-padded input, flattened so the input projection is a
    # single (T*Bp, D) @ (D, 4H) matmul inside the kernel.
    x_tm = jnp.transpose(video, (1, 0, 2)).astype(f32)                  # (T, B, D)
    x_tm = jnp.pad(x_tm, ((0, 0), (0, Bp - B), (0, 0)))
    x2d = x_tm.reshape(T * Bp, D)

    w1_t = params["w1"].T.astype(f32)                                   # (H, H)
    b1 = params["b1"].reshape(1, H).astype(f32)

    # Head weights zero-padded & block-placed into one lane-dense output slab.
    w2p = jnp.zeros((H, HEADW), f32).at[:, 0:n_prop].set(params["w2"].T)
    wcp = jnp.zeros((H, HEADW), f32).at[:, n_prop:n_out].set(params["wc"].T)
    b_heads = (jnp.zeros((1, HEADW), f32)
               .at[0, 0:n_prop].set(params["b2"])
               .at[0, n_prop:n_out].set(params["bc"]))

    # Block-diagonal segment-sum matrix: groups of C consecutive classes.
    seg = jnp.arange(PC) // C
    segmat = (seg[:, None] == seg[None, :]).astype(f32)                 # (PC, PC)

    kernel = functools.partial(fused_forward_kernel, T=T, Bp=Bp, H=H,
                               n_prop=n_prop, n_cls=PC)
    vmem = pl.BlockSpec(memory_space=pltpu.MemorySpace.VMEM)
    head_slab = pl.pallas_call(
        kernel,
        out_shape=jax.ShapeDtypeStruct((Bp, HEADW), f32),
        in_specs=[vmem] * 10,
        out_specs=vmem,
    )(x2d, wih_t, whh_t, b_lstm, w1_t, b1, w2p, wcp, b_heads, segmat)

    proposals = head_slab[:B, 0:n_prop].reshape(B, P, 3)
    class_probs = head_slab[:B, n_prop:n_out].reshape(B, P, C)
    return proposals, class_probs


# ----------------------------------------------------------------------------
# Pure-JAX reference (numerical sanity check, mirrors PyTorch semantics)
# ----------------------------------------------------------------------------
def reference_forward(video, params, *, num_classes, max_proposals):
    B, T, D = video.shape
    H = params["w_hh"].shape[1]
    P, C = max_proposals, num_classes
    wih_t = params["w_ih"].T
    whh_t = params["w_hh"].T
    b = params["b_ih"] + params["b_hh"]

    def step(carry, xt):
        h, c = carry
        gates = xt @ wih_t + h @ whh_t + b
        i = jax.nn.sigmoid(gates[:, 0:H])
        f = jax.nn.sigmoid(gates[:, H:2 * H])
        g = jnp.tanh(gates[:, 2 * H:3 * H])
        o = jax.nn.sigmoid(gates[:, 3 * H:4 * H])
        c = f * c + i * g
        h = o * jnp.tanh(c)
        return (h, c), h

    h0 = jnp.zeros((B, H), jnp.float32)
    (_, _), hs = lax.scan(step, (h0, h0), jnp.transpose(video, (1, 0, 2)))
    avg = jnp.mean(hs, axis=0)
    z = jnp.maximum(avg @ params["w1"].T + params["b1"], 0.0)
    proposals = (z @ params["w2"].T + params["b2"]).reshape(B, P, 3)
    scores = (avg @ params["wc"].T + params["bc"]).reshape(B, P, C)
    probs = jax.nn.softmax(scores, axis=-1)
    return proposals, probs


# ----------------------------------------------------------------------------
# Main
# ----------------------------------------------------------------------------
if __name__ == "__main__":
    B, T = 2, 8
    video_dim, hidden_dim = 16, 32
    num_classes, max_proposals = 5, 4
    H, D, P, C = hidden_dim, video_dim, max_proposals, num_classes

    key = jax.random.PRNGKey(0)
    ks = jax.random.split(key, 11)
    scale = 0.1
    params = {
        "w_ih": scale * jax.random.normal(ks[0], (4 * H, D), jnp.float32),
        "w_hh": scale * jax.random.normal(ks[1], (4 * H, H), jnp.float32),
        "b_ih": scale * jax.random.normal(ks[2], (4 * H,), jnp.float32),
        "b_hh": scale * jax.random.normal(ks[3], (4 * H,), jnp.float32),
        "w1": scale * jax.random.normal(ks[4], (H, H), jnp.float32),
        "b1": scale * jax.random.normal(ks[5], (H,), jnp.float32),
        "w2": scale * jax.random.normal(ks[6], (3 * P, H), jnp.float32),
        "b2": scale * jax.random.normal(ks[7], (3 * P,), jnp.float32),
        "wc": scale * jax.random.normal(ks[8], (P * C, H), jnp.float32),
        "bc": scale * jax.random.normal(ks[9], (P * C,), jnp.float32),
    }
    video = jax.random.normal(ks[10], (B, T, D), jnp.float32)

    proposals, class_probs = temporal_action_forward(
        video, params, num_classes=num_classes, max_proposals=max_proposals)
    jax.block_until_ready((proposals, class_probs))

    ref_prop, ref_probs = reference_forward(
        video, params, num_classes=num_classes, max_proposals=max_proposals)
    assert proposals.shape == (B, P, 3) and class_probs.shape == (B, P, C)
    assert jnp.allclose(proposals, ref_prop, atol=2e-3, rtol=2e-3)
    assert jnp.allclose(class_probs, ref_probs, atol=2e-3, rtol=2e-3)
    assert jnp.allclose(jnp.sum(class_probs, axis=-1), 1.0, atol=1e-5)

    print("KERNEL_OK")
</pallas_src>

<mosaic_0001>
module attributes {stable_mosaic.version = 11 : i64} {
  func.func @fused_forward_kernel(%arg0: memref<64x16xf32, #tpu.memory_space<vmem>>, %arg1: memref<16x128xf32, #tpu.memory_space<vmem>>, %arg2: memref<32x128xf32, #tpu.memory_space<vmem>>, %arg3: memref<1x128xf32, #tpu.memory_space<vmem>>, %arg4: memref<32x32xf32, #tpu.memory_space<vmem>>, %arg5: memref<1x32xf32, #tpu.memory_space<vmem>>, %arg6: memref<32x128xf32, #tpu.memory_space<vmem>>, %arg7: memref<32x128xf32, #tpu.memory_space<vmem>>, %arg8: memref<1x128xf32, #tpu.memory_space<vmem>>, %arg9: memref<20x20xf32, #tpu.memory_space<vmem>>, %arg10: memref<8x128xf32, #tpu.memory_space<vmem>>) attributes {dimension_semantics = [], scalar_prefetch = 0 : i64, scratch_operands = 0 : i64, tpu.core_type = #tpu.core_type<tc>} {
    %c0 = arith.constant 0 : index
    %c0_0 = arith.constant 0 : index
    %0 = vector.load %arg0[%c0, %c0_0] : memref<64x16xf32, #tpu.memory_space<vmem>>, vector<64x16xf32>
    %c0_1 = arith.constant 0 : index
    %c0_2 = arith.constant 0 : index
    %1 = vector.load %arg1[%c0_1, %c0_2] : memref<16x128xf32, #tpu.memory_space<vmem>>, vector<16x128xf32>
    %cst = arith.constant dense<0.000000e+00> : vector<64x128xf32>
    %2 = tpu.matmul %0, %1, %cst {dimension_numbers = #tpu.dot_dimension_numbers<[1], [0], [0], [1], [0, 0, 1, 1], [], []>} : vector<64x16xf32>, vector<16x128xf32>, vector<64x128xf32> -> vector<64x128xf32>
    %c0_3 = arith.constant 0 : index
    %c0_4 = arith.constant 0 : index
    %3 = vector.load %arg3[%c0_3, %c0_4] : memref<1x128xf32, #tpu.memory_space<vmem>>, vector<1x128xf32>
    %4 = vector.broadcast %3 : vector<1x128xf32> to vector<64x128xf32>
    %5 = arith.addf %2, %4 : vector<64x128xf32>
    %c0_5 = arith.constant 0 : index
    %c0_6 = arith.constant 0 : index
    %6 = vector.load %arg2[%c0_5, %c0_6] : memref<32x128xf32, #tpu.memory_space<vmem>>, vector<32x128xf32>
    %cst_7 = arith.constant 0.000000e+00 : f32
    %7 = vector.broadcast %cst_7 : f32 to vector<8x32xf32>
    %cst_8 = arith.constant 0.000000e+00 : f32
    %8 = vector.broadcast %cst_8 : f32 to vector<8x32xf32>
    %cst_9 = arith.constant 0.000000e+00 : f32
    %9 = vector.broadcast %cst_9 : f32 to vector<8x32xf32>
    %10 = vector.extract_strided_slice %5 {offsets = [0, 0], sizes = [8, 128], strides = [1, 1]} : vector<64x128xf32> to vector<8x128xf32>
    %cst_10 = arith.constant dense<0.000000e+00> : vector<8x128xf32>
    %11 = tpu.matmul %7, %6, %cst_10 {dimension_numbers = #tpu.dot_dimension_numbers<[1], [0], [0], [1], [0, 0, 1, 1], [], []>} : vector<8x32xf32>, vector<32x128xf32>, vector<8x128xf32> -> vector<8x128xf32>
    %12 = arith.addf %10, %11 : vector<8x128xf32>
    %13 = vector.extract_strided_slice %12 {offsets = [0, 0], sizes = [8, 96], strides = [1, 1]} : vector<8x128xf32> to vector<8x96xf32>
    %14 = arith.negf %13 : vector<8x96xf32>
    %15 = math.exp %14 : vector<8x96xf32>
    %cst_11 = arith.constant 1.000000e+00 : f32
    %16 = vector.broadcast %cst_11 : f32 to vector<8x96xf32>
    %17 = arith.addf %16, %15 : vector<8x96xf32>
    %18 = arith.divf %16, %17 : vector<8x96xf32>
    %19 = vector.extract_strided_slice %12 {offsets = [0, 96], sizes = [8, 32], strides = [1, 1]} : vector<8x128xf32> to vector<8x32xf32>
    %20 = math.tanh %19 : vector<8x32xf32>
    %21 = vector.extract_strided_slice %18 {offsets = [0, 0], sizes = [8, 32], strides = [1, 1]} : vector<8x96xf32> to vector<8x32xf32>
    %22 = vector.extract_strided_slice %18 {offsets = [0, 32], sizes = [8, 32], strides = [1, 1]} : vector<8x96xf32> to vector<8x32xf32>
    %23 = vector.extract_strided_slice %18 {offsets = [0, 64], sizes = [8, 32], strides = [1, 1]} : vector<8x96xf32> to vector<8x32xf32>
    %24 = arith.mulf %22, %8 : vector<8x32xf32>
    %25 = arith.mulf %21, %20 : vector<8x32xf32>
    %26 = arith.addf %24, %25 : vector<8x32xf32>
    %27 = math.tanh %26 : vector<8x32xf32>
    %28 = arith.mulf %23, %27 : vector<8x32xf32>
    %29 = arith.addf %9, %28 : vector<8x32xf32>
    %30 = vector.extract_strided_slice %5 {offsets = [8, 0], sizes = [8, 128], strides = [1, 1]} : vector<64x128xf32> to vector<8x128xf32>
    %cst_12 = arith.constant dense<0.000000e+00> : vector<8x128xf32>
    %31 = tpu.matmul %28, %6, %cst_12 {dimension_numbers = #tpu.dot_dimension_numbers<[1], [0], [0], [1], [0, 0, 1, 1], [], []>} : vector<8x32xf32>, vector<32x128xf32>, vector<8x128xf32> -> vector<8x128xf32>
    %32 = arith.addf %30, %31 : vector<8x128xf32>
    %33 = vector.extract_strided_slice %32 {offsets = [0, 0], sizes = [8, 96], strides = [1, 1]} : vector<8x128xf32> to vector<8x96xf32>
    %34 = arith.negf %33 : vector<8x96xf32>
    %35 = math.exp %34 : vector<8x96xf32>
    %cst_13 = arith.constant 1.000000e+00 : f32
    %36 = vector.broadcast %cst_13 : f32 to vector<8x96xf32>
    %37 = arith.addf %36, %35 : vector<8x96xf32>
    %38 = arith.divf %36, %37 : vector<8x96xf32>
    %39 = vector.extract_strided_slice %32 {offsets = [0, 96], sizes = [8, 32], strides = [1, 1]} : vector<8x128xf32> to vector<8x32xf32>
    %40 = math.tanh %39 : vector<8x32xf32>
    %41 = vector.extract_strided_slice %38 {offsets = [0, 0], sizes = [8, 32], strides = [1, 1]} : vector<8x96xf32> to vector<8x32xf32>
    %42 = vector.extract_strided_slice %38 {offsets = [0, 32], sizes = [8, 32], strides = [1, 1]} : vector<8x96xf32> to vector<8x32xf32>
    %43 = vector.extract_strided_slice %38 {offsets = [0, 64], sizes = [8, 32], strides = [1, 1]} : vector<8x96xf32> to vector<8x32xf32>
    %44 = arith.mulf %42, %26 : vector<8x32xf32>
    %45 = arith.mulf %41, %40 : vector<8x32xf32>
    %46 = arith.addf %44, %45 : vector<8x32xf32>
    %47 = math.tanh %46 : vector<8x32xf32>
    %48 = arith.mulf %43, %47 : vector<8x32xf32>
    %49 = arith.addf %29, %48 : vector<8x32xf32>
    %50 = vector.extract_strided_slice %5 {offsets = [16, 0], sizes = [8, 128], strides = [1, 1]} : vector<64x128xf32> to vector<8x128xf32>
    %cst_14 = arith.constant dense<0.000000e+00> : vector<8x128xf32>
    %51 = tpu.matmul %48, %6, %cst_14 {dimension_numbers = #tpu.dot_dimension_numbers<[1], [0], [0], [1], [0, 0, 1, 1], [], []>} : vector<8x32xf32>, vector<32x128xf32>, vector<8x128xf32> -> vector<8x128xf32>
    %52 = arith.addf %50, %51 : vector<8x128xf32>
    %53 = vector.extract_strided_slice %52 {offsets = [0, 0], sizes = [8, 96], strides = [1, 1]} : vector<8x128xf32> to vector<8x96xf32>
    %54 = arith.negf %53 : vector<8x96xf32>
    %55 = math.exp %54 : vector<8x96xf32>
    %cst_15 = arith.constant 1.000000e+00 : f32
    %56 = vector.broadcast %cst_15 : f32 to vector<8x96xf32>
    %57 = arith.addf %56, %55 : vector<8x96xf32>
    %58 = arith.divf %56, %57 : vector<8x96xf32>
    %59 = vector.extract_strided_slice %52 {offsets = [0, 96], sizes = [8, 32], strides = [1, 1]} : vector<8x128xf32> to vector<8x32xf32>
    %60 = math.tanh %59 : vector<8x32xf32>
    %61 = vector.extract_strided_slice %58 {offsets = [0, 0], sizes = [8, 32], strides = [1, 1]} : vector<8x96xf32> to vector<8x32xf32>
    %62 = vector.extract_strided_slice %58 {offsets = [0, 32], sizes = [8, 32], strides = [1, 1]} : vector<8x96xf32> to vector<8x32xf32>
    %63 = vector.extract_strided_slice %58 {offsets = [0, 64], sizes = [8, 32], strides = [1, 1]} : vector<8x96xf32> to vector<8x32xf32>
    %64 = arith.mulf %62, %46 : vector<8x32xf32>
    %65 = arith.mulf %61, %60 : vector<8x32xf32>
    %66 = arith.addf %64, %65 : vector<8x32xf32>
    %67 = math.tanh %66 : vector<8x32xf32>
    %68 = arith.mulf %63, %67 : vector<8x32xf32>
    %69 = arith.addf %49, %68 : vector<8x32xf32>
    %70 = vector.extract_strided_slice %5 {offsets = [24, 0], sizes = [8, 128], strides = [1, 1]} : vector<64x128xf32> to vector<8x128xf32>
    %cst_16 = arith.constant dense<0.000000e+00> : vector<8x128xf32>
    %71 = tpu.matmul %68, %6, %cst_16 {dimension_numbers = #tpu.dot_dimension_numbers<[1], [0], [0], [1], [0, 0, 1, 1], [], []>} : vector<8x32xf32>, vector<32x128xf32>, vector<8x128xf32> -> vector<8x128xf32>
    %72 = arith.addf %70, %71 : vector<8x128xf32>
    %73 = vector.extract_strided_slice %72 {offsets = [0, 0], sizes = [8, 96], strides = [1, 1]} : vector<8x128xf32> to vector<8x96xf32>
    %74 = arith.negf %73 : vector<8x96xf32>
    %75 = math.exp %74 : vector<8x96xf32>
    %cst_17 = arith.constant 1.000000e+00 : f32
    %76 = vector.broadcast %cst_17 : f32 to vector<8x96xf32>
    %77 = arith.addf %76, %75 : vector<8x96xf32>
    %78 = arith.divf %76, %77 : vector<8x96xf32>
    %79 = vector.extract_strided_slice %72 {offsets = [0, 96], sizes = [8, 32], strides = [1, 1]} : vector<8x128xf32> to vector<8x32xf32>
    %80 = math.tanh %79 : vector<8x32xf32>
    %81 = vector.extract_strided_slice %78 {offsets = [0, 0], sizes = [8, 32], strides = [1, 1]} : vector<8x96xf32> to vector<8x32xf32>
    %82 = vector.extract_strided_slice %78 {offsets = [0, 32], sizes = [8, 32], strides = [1, 1]} : vector<8x96xf32> to vector<8x32xf32>
    %83 = vector.extract_strided_slice %78 {offsets = [0, 64], sizes = [8, 32], strides = [1, 1]} : vector<8x96xf32> to vector<8x32xf32>
    %84 = arith.mulf %82, %66 : vector<8x32xf32>
    %85 = arith.mulf %81, %80 : vector<8x32xf32>
    %86 = arith.addf %84, %85 : vector<8x32xf32>
    %87 = math.tanh %86 : vector<8x32xf32>
    %88 = arith.mulf %83, %87 : vector<8x32xf32>
    %89 = arith.addf %69, %88 : vector<8x32xf32>
    %90 = vector.extract_strided_slice %5 {offsets = [32, 0], sizes = [8, 128], strides = [1, 1]} : vector<64x128xf32> to vector<8x128xf32>
    %cst_18 = arith.constant dense<0.000000e+00> : vector<8x128xf32>
    %91 = tpu.matmul %88, %6, %cst_18 {dimension_numbers = #tpu.dot_dimension_numbers<[1], [0], [0], [1], [0, 0, 1, 1], [], []>} : vector<8x32xf32>, vector<32x128xf32>, vector<8x128xf32> -> vector<8x128xf32>
    %92 = arith.addf %90, %91 : vector<8x128xf32>
    %93 = vector.extract_strided_slice %92 {offsets = [0, 0], sizes = [8, 96], strides = [1, 1]} : vector<8x128xf32> to vector<8x96xf32>
    %94 = arith.negf %93 : vector<8x96xf32>
    %95 = math.exp %94 : vector<8x96xf32>
    %cst_19 = arith.constant 1.000000e+00 : f32
    %96 = vector.broadcast %cst_19 : f32 to vector<8x96xf32>
    %97 = arith.addf %96, %95 : vector<8x96xf32>
    %98 = arith.divf %96, %97 : vector<8x96xf32>
    %99 = vector.extract_strided_slice %92 {offsets = [0, 96], sizes = [8, 32], strides = [1, 1]} : vector<8x128xf32> to vector<8x32xf32>
    %100 = math.tanh %99 : vector<8x32xf32>
    %101 = vector.extract_strided_slice %98 {offsets = [0, 0], sizes = [8, 32], strides = [1, 1]} : vector<8x96xf32> to vector<8x32xf32>
    %102 = vector.extract_strided_slice %98 {offsets = [0, 32], sizes = [8, 32], strides = [1, 1]} : vector<8x96xf32> to vector<8x32xf32>
    %103 = vector.extract_strided_slice %98 {offsets = [0, 64], sizes = [8, 32], strides = [1, 1]} : vector<8x96xf32> to vector<8x32xf32>
    %104 = arith.mulf %102, %86 : vector<8x32xf32>
    %105 = arith.mulf %101, %100 : vector<8x32xf32>
    %106 = arith.addf %104, %105 : vector<8x32xf32>
    %107 = math.tanh %106 : vector<8x32xf32>
    %108 = arith.mulf %103, %107 : vector<8x32xf32>
    %109 = arith.addf %89, %108 : vector<8x32xf32>
    %110 = vector.extract_strided_slice %5 {offsets = [40, 0], sizes = [8, 128], strides = [1, 1]} : vector<64x128xf32> to vector<8x128xf32>
    %cst_20 = arith.constant dense<0.000000e+00> : vector<8x128xf32>
    %111 = tpu.matmul %108, %6, %cst_20 {dimension_numbers = #tpu.dot_dimension_numbers<[1], [0], [0], [1], [0, 0, 1, 1], [], []>} : vector<8x32xf32>, vector<32x128xf32>, vector<8x128xf32> -> vector<8x128xf32>
    %112 = arith.addf %110, %111 : vector<8x128xf32>
    %113 = vector.extract_strided_slice %112 {offsets = [0, 0], sizes = [8, 96], strides = [1, 1]} : vector<8x128xf32> to vector<8x96xf32>
    %114 = arith.negf %113 : vector<8x96xf32>
    %115 = math.exp %114 : vector<8x96xf32>
    %cst_21 = arith.constant 1.000000e+00 : f32
    %116 = vector.broadcast %cst_21 : f32 to vector<8x96xf32>
    %117 = arith.addf %116, %115 : vector<8x96xf32>
    %118 = arith.divf %116, %117 : vector<8x96xf32>
    %119 = vector.extract_strided_slice %112 {offsets = [0, 96], sizes = [8, 32], strides = [1, 1]} : vector<8x128xf32> to vector<8x32xf32>
    %120 = math.tanh %119 : vector<8x32xf32>
    %121 = vector.extract_strided_slice %118 {offsets = [0, 0], sizes = [8, 32], strides = [1, 1]} : vector<8x96xf32> to vector<8x32xf32>
    %122 = vector.extract_strided_slice %118 {offsets = [0, 32], sizes = [8, 32], strides = [1, 1]} : vector<8x96xf32> to vector<8x32xf32>
    %123 = vector.extract_strided_slice %118 {offsets = [0, 64], sizes = [8, 32], strides = [1, 1]} : vector<8x96xf32> to vector<8x32xf32>
    %124 = arith.mulf %122, %106 : vector<8x32xf32>
    %125 = arith.mulf %121, %120 : vector<8x32xf32>
    %126 = arith.addf %124, %125 : vector<8x32xf32>
    %127 = math.tanh %126 : vector<8x32xf32>
    %128 = arith.mulf %123, %127 : vector<8x32xf32>
    %129 = arith.addf %109, %128 : vector<8x32xf32>
    %130 = vector.extract_strided_slice %5 {offsets = [48, 0], sizes = [8, 128], strides = [1, 1]} : vector<64x128xf32> to vector<8x128xf32>
    %cst_22 = arith.constant dense<0.000000e+00> : vector<8x128xf32>
    %131 = tpu.matmul %128, %6, %cst_22 {dimension_numbers = #tpu.dot_dimension_numbers<[1], [0], [0], [1], [0, 0, 1, 1], [], []>} : vector<8x32xf32>, vector<32x128xf32>, vector<8x128xf32> -> vector<8x128xf32>
    %132 = arith.addf %130, %131 : vector<8x128xf32>
    %133 = vector.extract_strided_slice %132 {offsets = [0, 0], sizes = [8, 96], strides = [1, 1]} : vector<8x128xf32> to vector<8x96xf32>
    %134 = arith.negf %133 : vector<8x96xf32>
    %135 = math.exp %134 : vector<8x96xf32>
    %cst_23 = arith.constant 1.000000e+00 : f32
    %136 = vector.broadcast %cst_23 : f32 to vector<8x96xf32>
    %137 = arith.addf %136, %135 : vector<8x96xf32>
    %138 = arith.divf %136, %137 : vector<8x96xf32>
    %139 = vector.extract_strided_slice %132 {offsets = [0, 96], sizes = [8, 32], strides = [1, 1]} : vector<8x128xf32> to vector<8x32xf32>
    %140 = math.tanh %139 : vector<8x32xf32>
    %141 = vector.extract_strided_slice %138 {offsets = [0, 0], sizes = [8, 32], strides = [1, 1]} : vector<8x96xf32> to vector<8x32xf32>
    %142 = vector.extract_strided_slice %138 {offsets = [0, 32], sizes = [8, 32], strides = [1, 1]} : vector<8x96xf32> to vector<8x32xf32>
    %143 = vector.extract_strided_slice %138 {offsets = [0, 64], sizes = [8, 32], strides = [1, 1]} : vector<8x96xf32> to vector<8x32xf32>
    %144 = arith.mulf %142, %126 : vector<8x32xf32>
    %145 = arith.mulf %141, %140 : vector<8x32xf32>
    %146 = arith.addf %144, %145 : vector<8x32xf32>
    %147 = math.tanh %146 : vector<8x32xf32>
    %148 = arith.mulf %143, %147 : vector<8x32xf32>
    %149 = arith.addf %129, %148 : vector<8x32xf32>
    %150 = vector.extract_strided_slice %5 {offsets = [56, 0], sizes = [8, 128], strides = [1, 1]} : vector<64x128xf32> to vector<8x128xf32>
    %cst_24 = arith.constant dense<0.000000e+00> : vector<8x128xf32>
    %151 = tpu.matmul %148, %6, %cst_24 {dimension_numbers = #tpu.dot_dimension_numbers<[1], [0], [0], [1], [0, 0, 1, 1], [], []>} : vector<8x32xf32>, vector<32x128xf32>, vector<8x128xf32> -> vector<8x128xf32>
    %152 = arith.addf %150, %151 : vector<8x128xf32>
    %153 = vector.extract_strided_slice %152 {offsets = [0, 0], sizes = [8, 96], strides = [1, 1]} : vector<8x128xf32> to vector<8x96xf32>
    %154 = arith.negf %153 : vector<8x96xf32>
    %155 = math.exp %154 : vector<8x96xf32>
    %cst_25 = arith.constant 1.000000e+00 : f32
    %156 = vector.broadcast %cst_25 : f32 to vector<8x96xf32>
    %157 = arith.addf %156, %155 : vector<8x96xf32>
    %158 = arith.divf %156, %157 : vector<8x96xf32>
    %159 = vector.extract_strided_slice %152 {offsets = [0, 96], sizes = [8, 32], strides = [1, 1]} : vector<8x128xf32> to vector<8x32xf32>
    %160 = math.tanh %159 : vector<8x32xf32>
    %161 = vector.extract_strided_slice %158 {offsets = [0, 0], sizes = [8, 32], strides = [1, 1]} : vector<8x96xf32> to vector<8x32xf32>
    %162 = vector.extract_strided_slice %158 {offsets = [0, 32], sizes = [8, 32], strides = [1, 1]} : vector<8x96xf32> to vector<8x32xf32>
    %163 = vector.extract_strided_slice %158 {offsets = [0, 64], sizes = [8, 32], strides = [1, 1]} : vector<8x96xf32> to vector<8x32xf32>
    %164 = arith.mulf %162, %146 : vector<8x32xf32>
    %165 = arith.mulf %161, %160 : vector<8x32xf32>
    %166 = arith.addf %164, %165 : vector<8x32xf32>
    %167 = math.tanh %166 : vector<8x32xf32>
    %168 = arith.mulf %163, %167 : vector<8x32xf32>
    %169 = arith.addf %149, %168 : vector<8x32xf32>
    %cst_26 = arith.constant 1.250000e-01 : f32
    %170 = vector.broadcast %cst_26 : f32 to vector<8x32xf32>
    %171 = arith.mulf %169, %170 : vector<8x32xf32>
    %c0_27 = arith.constant 0 : index
    %c0_28 = arith.constant 0 : index
    %172 = vector.load %arg4[%c0_27, %c0_28] : memref<32x32xf32, #tpu.memory_space<vmem>>, vector<32x32xf32>
    %cst_29 = arith.constant dense<0.000000e+00> : vector<8x32xf32>
    %173 = tpu.matmul %171, %172, %cst_29 {dimension_numbers = #tpu.dot_dimension_numbers<[1], [0], [0], [1], [0, 0, 1, 1], [], []>} : vector<8x32xf32>, vector<32x32xf32>, vector<8x32xf32> -> vector<8x32xf32>
    %c0_30 = arith.constant 0 : index
    %c0_31 = arith.constant 0 : index
    %174 = vector.load %arg5[%c0_30, %c0_31] : memref<1x32xf32, #tpu.memory_space<vmem>>, vector<1x32xf32>
    %175 = vector.broadcast %174 : vector<1x32xf32> to vector<8x32xf32>
    %176 = arith.addf %173, %175 : vector<8x32xf32>
    %cst_32 = arith.constant 0.000000e+00 : f32
    %177 = vector.broadcast %cst_32 : f32 to vector<8x32xf32>
    %178 = arith.maximumf %176, %177 : vector<8x32xf32>
    %c0_33 = arith.constant 0 : index
    %c0_34 = arith.constant 0 : index
    %179 = vector.load %arg6[%c0_33, %c0_34] : memref<32x128xf32, #tpu.memory_space<vmem>>, vector<32x128xf32>
    %cst_35 = arith.constant dense<0.000000e+00> : vector<8x128xf32>
    %180 = tpu.matmul %178, %179, %cst_35 {dimension_numbers = #tpu.dot_dimension_numbers<[1], [0], [0], [1], [0, 0, 1, 1], [], []>} : vector<8x32xf32>, vector<32x128xf32>, vector<8x128xf32> -> vector<8x128xf32>
    %c0_36 = arith.constant 0 : index
    %c0_37 = arith.constant 0 : index
    %181 = vector.load %arg7[%c0_36, %c0_37] : memref<32x128xf32, #tpu.memory_space<vmem>>, vector<32x128xf32>
    %cst_38 = arith.constant dense<0.000000e+00> : vector<8x128xf32>
    %182 = tpu.matmul %171, %181, %cst_38 {dimension_numbers = #tpu.dot_dimension_numbers<[1], [0], [0], [1], [0, 0, 1, 1], [], []>} : vector<8x32xf32>, vector<32x128xf32>, vector<8x128xf32> -> vector<8x128xf32>
    %183 = arith.addf %180, %182 : vector<8x128xf32>
    %c0_39 = arith.constant 0 : index
    %c0_40 = arith.constant 0 : index
    %184 = vector.load %arg8[%c0_39, %c0_40] : memref<1x128xf32, #tpu.memory_space<vmem>>, vector<1x128xf32>
    %185 = vector.broadcast %184 : vector<1x128xf32> to vector<8x128xf32>
    %186 = arith.addf %183, %185 : vector<8x128xf32>
    %187 = vector.extract_strided_slice %186 {offsets = [0, 12], sizes = [8, 20], strides = [1, 1]} : vector<8x128xf32> to vector<8x20xf32>
    %cst_41 = arith.constant dense<0xFF800000> : vector<8xf32>
    %188 = vector.multi_reduction <maximumf>, %187, %cst_41 [1] : vector<8x20xf32> to vector<8xf32>
    %189 = vector.shape_cast %188 : vector<8xf32> to vector<8x1xf32>
    %190 = vector.broadcast %189 : vector<8x1xf32> to vector<8x20xf32>
    %191 = arith.subf %187, %190 : vector<8x20xf32>
    %192 = math.exp %191 : vector<8x20xf32>
    %c0_42 = arith.constant 0 : index
    %c0_43 = arith.constant 0 : index
    %193 = vector.load %arg9[%c0_42, %c0_43] : memref<20x20xf32, #tpu.memory_space<vmem>>, vector<20x20xf32>
    %cst_44 = arith.constant dense<0.000000e+00> : vector<8x20xf32>
    %194 = tpu.matmul %192, %193, %cst_44 {dimension_numbers = #tpu.dot_dimension_numbers<[1], [0], [0], [1], [0, 0, 1, 1], [], []>} : vector<8x20xf32>, vector<20x20xf32>, vector<8x20xf32> -> vector<8x20xf32>
    %195 = tpu.reciprocal %194 : vector<8x20xf32> -> vector<8x20xf32>
    %196 = arith.mulf %192, %195 : vector<8x20xf32>
    %c0_45 = arith.constant 0 : index
    %c0_46 = arith.constant 0 : index
    %197 = vector.load %arg10[%c0_45, %c0_46] : memref<8x128xf32, #tpu.memory_space<vmem>>, vector<8x128xf32>
    tpu.vector_store %arg10[%c0_45, %c0_46], %186 {strides = array<i32>} : memref<8x128xf32, #tpu.memory_space<vmem>>, vector<8x128xf32>,
    %c0_47 = arith.constant 0 : index
    %c12 = arith.constant 12 : index
    %198 = vector.load %arg10[%c0_47, %c12] : memref<8x128xf32, #tpu.memory_space<vmem>>, vector<8x20xf32>
    tpu.vector_store %arg10[%c0_47, %c12], %196 {strides = array<i32>} : memref<8x128xf32, #tpu.memory_space<vmem>>, vector<8x20xf32>,
    return
  }
}

</mosaic_0001>

<bundles_post_ra>
// kernel: tpu_custom_call.1
= control target key start
LH: loop header
LB: loop body
LE: loop exit
PB: predicated region body
PF: predicated region fallthrough
CT: control target
= control target key end

     0   :  { %15 = vsyncpa [#allocation3], 0  ;;  %s2238_s0 = inlined_call_operand.vmem [shape: f32[64,16], index: 0, kind: input, shape index: {}]   ;;  %s2239_s1 = inlined_call_operand.hbm [shape: f32[16,128], index: 1, kind: input, shape index: {}]   ;;  %s2240_s2 = inlined_call_operand.vmem [shape: f32[32,128], index: 2, kind: input, shape index: {}]   ;;  %s2241_s3 = inlined_call_operand.vmem [shape: f32[1,128], index: 3, kind: input, shape index: {}]   ;;  %s2242_s4 = inlined_call_operand.vmem [shape: f32[32,32], index: 4, kind: input, shape index: {}]   ;;  %s2243_s5 = inlined_call_operand.vmem [shape: f32[1,32], index: 5, kind: input, shape index: {}]   ;;  %s2244_s6 = inlined_call_operand.vmem [shape: f32[32,128], index: 6, kind: input, shape index: {}]   ;;  %s2245_s7 = inlined_call_operand.hbm [shape: f32[32,128], index: 7, kind: input, shape index: {}]   ;;  %s2246_s8 = inlined_call_operand.vmem [shape: f32[1,128], index: 8, kind: input, shape index: {}]   ;;  %s2247_s9 = inlined_call_operand.hbm [shape: f32[20,20], index: 9, kind: input, shape index: {}]   ;;  %s2248_s10 = inlined_call_operand.hbm [shape: f32[8,128], index: 10, kind: output, shape index: {}]  }
   0x1   :  { %16 = vsyncpa [#allocation6], 0 }
   0x2   :  { %17 = vsyncpa [#allocation4], 0  ;;  %s1890_s13 = smov [#allocation5]   ;;  %s1891_s15 = smov [#allocation2]  }
   0x3   :  { %s47_s14 = sshll.u32 %s1890_s13, 4  ;;  %s25_s16 = sshll.u32 %s1891_s15, 4  ;;  %s48_s14 = int_to_ptr.vmem [resolvable:$true] %s47_s14  ;;  %s1958_s16 = int_to_ptr.vmem [resolvable:$true] %s25_s16 }
   0x4   :  { %s1796_s19 = scalar_lea.hbm %s2245_s7, 512 }
   0x5   :  { %p1797_p0 = scmp.ne.s32.totalorder %s2245_s7, %s1796_s19  ;;  %p1800_p1 = scmp.lt.u32.totalorder %s1796_s19, %s2245_s7 }
   0x7   :  { %p1802_p2 = pnand %p1800_p1, %p1797_p0 }
   0x9   :  { %1805 = shalt.err (!%p1802_p2)
}
   0xa   :  { %s1806_s24 = scalar_lea.vmem %s48_s14, 512  ;;  %p1811_p4 = scmp.lt.s32.totalorder %s48_s14, %s48_s14 }
   0xb   :  { %p1807_p3 = scmp.ne.s32.totalorder %s48_s14, %s1806_s24  ;;  %p1812_p5 = scmp.lt.s32.totalorder %s1806_s24, %s1806_s24 }
   0xd   :  { %p1813_p6 = por %p1812_p5, %p1811_p4 }
   0xf   :  { %p1814_p7 = pnand %p1813_p6, %p1807_p3 }
  0x11   :  { %1817 = shalt.err (!%p1814_p7)
}
  0x12   :  { %s1892_s25 = smov 128   ;;  %s1893_s26 = smov 8  }
  0x13   :  { %53 = dma.hbm_to_vmem [thread:$0]  %s2245_s7, 512, %s48_s14, [#allocation6], %s1892_s25, %s1892_s25, %s1893_s26  }
  0x14   :  { %s1818_s11 = scalar_lea.hbm %s2239_s1, 256 }
  0x15   :  { %p1819_p8 = scmp.ne.s32.totalorder %s2239_s1, %s1818_s11  ;;  %p1822_p9 = scmp.lt.u32.totalorder %s1818_s11, %s2239_s1 }
  0x17   :  { %p1824_p10 = pnand %p1822_p9, %p1819_p8 }
  0x19   :  { %1827 = shalt.err (!%p1824_p10)
}
  0x1a   :  { %s1828_s18 = scalar_lea.vmem %s1958_s16, 256  ;;  %p1833_p12 = scmp.lt.s32.totalorder %s1958_s16, %s1958_s16 }
  0x1b   :  { %p1829_p11 = scmp.ne.s32.totalorder %s1958_s16, %s1828_s18  ;;  %p1834_p13 = scmp.lt.s32.totalorder %s1828_s18, %s1828_s18 }
  0x1d   :  { %p1835_p0 = por %p1834_p13, %p1833_p12 }
  0x1f   :  { %p1836_p1 = pnand %p1835_p0, %p1829_p11 }
  0x21   :  { %1839 = shalt.err (!%p1836_p1)
}
  0x22   :  { %31 = dma.hbm_to_vmem [thread:$0]  %s2239_s1, 256, %s1958_s16, [#allocation3], %s1892_s25, %s1892_s25, %s1893_s26  }
  0x23   :  { %s1894_s19 = smov [#allocation7]   ;;  %s1840_s23 = scalar_lea.hbm %s2247_s9, 384 }
  0x24   :  { %s61_s20 = sshll.u32 %s1894_s19, 4  ;;  %p1841_p2 = scmp.ne.s32.totalorder %s2247_s9, %s1840_s23  ;;  %s62_s20 = int_to_ptr.vmem [resolvable:$true] %s61_s20 }
  0x25   :  { %p1844_p3 = scmp.lt.u32.totalorder %s1840_s23, %s2247_s9 }
  0x27   :  { %p1846_p4 = pnand %p1844_p3, %p1841_p2 }
  0x29   :  { %1849 = shalt.err (!%p1846_p4)
}
  0x2a   :  { %s1850_s30 = scalar_lea.vmem %s62_s20, 384  ;;  %p1855_p6 = scmp.lt.s32.totalorder %s62_s20, %s62_s20 }
  0x2b   :  { %p1851_p5 = scmp.ne.s32.totalorder %s62_s20, %s1850_s30  ;;  %p1856_p7 = scmp.lt.s32.totalorder %s1850_s30, %s1850_s30 }
  0x2d   :  { %p1857_p8 = por %p1856_p7, %p1855_p6 }
  0x2f   :  { %p1858_p9 = pnand %p1857_p8, %p1851_p5 }
  0x31   :  { %1861 = shalt.err (!%p1858_p9)
}
  0x32   :  { %67 = dma.hbm_to_vmem [thread:$0]  %s2247_s9, 384, %s62_s20, [#allocation6], %s1892_s25, %s1892_s25, %s1893_s26  }
  0x33   :  { %1884 = dma.done.wait [#allocation3], 256  }
  0x34   :  { %1885 = vsyncadd [#allocation3], 4294967040 }
  0x35   :  { %1886 = dma.done.wait [#allocation6], 896  }
  0x36   :  { %1887 = vsyncadd [#allocation6], 4294966400  ;;  %v1895_v0 = vmov 0.0|0.0   ;;  %vm1896_vm0 = vmmov 0   ;;  %v1897_v1 = vmov 0.0   ;;  %vm94_vm1 = vcmask 130048  }
  0x37   :  { %1646 = vmatprep.subr.bf16.mxu1 %v1895_v0  ;;  %1520 = vmatprep.mubr.msk.f32.mxu1 %vm1896_vm0, %v1897_v1  ;;  %v85_v2 = vld [vmem:[#allocation2] sm:$0xff]  ;;  %v86_v3 = vld [vmem:[#allocation2 + $0x8] sm:$0xff]  ;;  %v226_v9 = vld [vmem:[%s2240_s2 + $0x10] sm:$0xff]  ;;  %s1898_s21 = smov 32   ;;  %vm228_vm2 = vcmask 261120   ;;  %vm1282_vm3 = vcmask 261216  }
  0x38   :  { %v224_v4 = vld [vmem:[%s2240_s2] sm:$0xff]  ;;  %v1642_v5 = vpack.c.bf16 %v86_v3, %v85_v2  ;;  %v225_v6 = vld [vmem:[%s2240_s2 + $0x8] sm:$0xff]  ;;  %v227_v10 = vld [vmem:[%s2240_s2 + $0x18] sm:$0xff]  ;;  %vm1298_vm4 = vcmask 1043456   ;;  %vm1295_vm5 = vcmask 162816  }
  0x39   :  { %v77_v7 = vld [vmem:[%s2238_s0] sm:$0xff]  ;;  %v2022_v8 = vpack.c.bf16 %v225_v6, %v224_v4  ;;  %v78_v11 = vld [vmem:[%s2238_s0 + $0x8] sm:$0xff]  ;;  %v2035_v12 = vpack.c.bf16 %v227_v10, %v226_v9  ;;  %v79_v48 = vld [vmem:[%s2238_s0 + $0x10] sm:$0xff] }
  0x3a   :  { %1500 = vmatprep.mubr.msk.f32.mxu0 %vm94_vm1, %v77_v7  ;;  %1643 = vmatprep.subr.bf16.mxu0 %v1642_v5  ;;  %v2056_v13 = vld [vmem:[%s2241_s3] ss:$0 sm:$0xff]  ;;  %s1899_s3 = smov 64   ;;  %v80_v49 = vld [vmem:[%s2238_s0 + $0x18] sm:$0xff]  ;;  %v82_v51 = vld [vmem:[%s2238_s0 + $0x28] sm:$0xff] }
  0x3b   :  { %1648 = vmatpush3.bf16.msra.mxu1 %v2022_v8  ;;  %1645 = vmatpush3.bf16.msra.mxu0 %v1642_v5  ;;  %v81_v50 = vld [vmem:[%s2238_s0 + $0x20] sm:$0xff]  ;;  %v83_v52 = vld [vmem:[%s2238_s0 + $0x30] sm:$0xff]  ;;  %v84_v53 = vld [vmem:[%s2238_s0 + $0x38] sm:$0xff] }
  0x3c   :  { %1649 = vmatprep.subr.bf16.mxu1 %v1895_v0  ;;  %1658 = vmatprep.subr.bf16.mxu0 %v1895_v0 }
  0x3e   :  { %1501 = vmatmul.mubr.msk.f32.vlgmr.msra.gmra.mrb[0].mxu0 %vm94_vm1, %v78_v11 }
  0x3f   :  { %1651 = vmatpush3.bf16.msra.mxu1 %v2035_v12  ;;  %1660 = vmatpush3.bf16.msra.mxu0 %v2022_v8 }
  0x40   :  { %1652 = vmatprep.subr.bf16.mxu1 %v1895_v0  ;;  %1661 = vmatprep.subr.bf16.mxu0 %v1895_v0 }
  0x41   :  { %1503 = vmatprep.mubr.msk.f32.mxu0 %vm94_vm1, %v79_v48 }
  0x42   :  { %1521 = vmatmul.mubr.f32.vlgmr.msra.gmra.mrb[0].mxu1 %v1897_v1  ;;  %1504 = vmatmul.mubr.msk.f32.gmra.mrb[2].mxu0 %vm94_vm1, %v80_v49 }
  0x43   :  { %1654 = vmatpush3.bf16.msra.mxu1 %v2022_v8  ;;  %1531 = vmatprep.mubr.msk.f32.mxu1 %vm1896_vm0, %v1897_v1 }
  0x44   :  { %1655 = vmatprep.subr.bf16.mxu1 %v1895_v0  ;;  %1663 = vmatpush3.bf16.msra.mxu0 %v2035_v12 }
  0x45   :  { %1670 = vmatprep.subr.bf16.mxu0 %v1895_v0  ;;  %1506 = vmatprep.mubr.msk.f32.mxu0 %vm94_vm1, %v81_v50 }
  0x46   :  { %1507 = vmatmul.mubr.msk.f32.gmra.mrb[4].mxu0 %vm94_vm1, %v82_v51 }
  0x47   :  { %1657 = vmatpush3.bf16.msra.mxu1 %v2035_v12  ;;  %1509 = vmatprep.mubr.msk.f32.mxu0 %vm94_vm1, %v83_v52 }
  0x48   :  { %1664 = vmatprep.subr.bf16.mxu1 %v1895_v0 }
  0x4a   :  { %1510 = vmatmul.mubr.msk.f32.gmra.mrb[6].mxu0 %vm94_vm1, %v84_v53 }
  0x4b   :  { %1542 = vmatprep.mubr.msk.f32.mxu0 %vm1896_vm0, %v1897_v1 }
 0x111   :  { %v1502_v14 = vpop.f32.mrb[0].mxu0 }
 0x112   :  { %v185_v15 = vpop.f32.mrb[1].mxu0  ;;  %v191_v34 = vadd.f32 %v1502_v14, %v2056_v13 }
 0x113   :  { %v186_v16 = vadd.f32 %v2056_v13, %v185_v15 }
 0x115   :  { %v298_v17 = vpop.f32.mrb[0].mxu1  ;;  %v1505_v57 = vpop.f32.mrb[2].mxu0 }
 0x116   :  { %v302_v18 = vadd.f32 %v298_v17, %v186_v16  ;;  %v1522_v19 = vpop.f32.mrb[1].mxu1  ;;  %v195_v58 = vpop.f32.mrb[3].mxu0 }
 0x117   :  { %v196_v2 = vadd.f32 %v2056_v13, %v195_v58 }
 0x118   :  { %1728 = vtanh.f32 %v302_v18  ;;  %v1405_v21 = vmul.f32 -1.442695, %v302_v18 }
 0x119   :  { %v2104_v59 = vpop.f32.mrb[4].mxu0 }
 0x11a   :  { %1730 = vpow2.f32 %v1405_v21  ;;  %v2106_v60 = vpop.f32.mrb[5].mxu0 }
 0x11d   :  { %v2108_v61 = vpop.f32.mrb[6].mxu0 }
 0x11e   :  { %v2110_v62 = vpop.f32.mrb[7].mxu0 }
 0x122   :  { %v1729_v20 = vpop.eup %1728 }
 0x123   :  { %312 = vrot.lane.b32.xlu0 %v1729_v20, %s1898_s21 }
 0x124   :  { %v1731_v22 = vpop.eup %1730 }
 0x125   :  { %v306_v23 = vadd.f32 1.0, %v1731_v22 }
 0x127   :  { %1732 = vrcp.f32 %v306_v23 }
 0x131   :  { %v1733_v24 = vpop.eup %1732 }
 0x132   :  { %v310_v27 = vmul.f32 0.0, %v1733_v24 }
 0x195   :  { %v313_v25 = vpop.permute.xlu0 %312 }
 0x196   :  { %v315_v26 = vmul.f32 %v1733_v24, %v313_v25  ;;  %v201_v25 = vadd.f32 %v1505_v57, %v2056_v13 }
 0x198   :  { %317 = vrot.lane.b32.xlu0 %v315_v26, %s1898_s21 }
 0x20a   :  { %v318_v28 = vpop.permute.xlu0 %317 }
 0x20b   :  { %v320_v29 = vadd.f32 %v318_v28, %v310_v27 }
 0x20d   :  { %1734 = vtanh.f32 %v320_v29 }
 0x217   :  { %v1735_v30 = vpop.eup %1734 }
 0x218   :  { %323 = vrot.lane.b32.xlu1 %v1735_v30, %s1898_s21 }
 0x28a   :  { %v324_v31 = vpop.permute.xlu1 %323 }
 0x28b   :  { %v2062_v32 = vmul.f32 %v1733_v24, %v324_v31 }
 0x28d   :  { %329 = vrot.lane.b32.xlu1 %v2062_v32, %s1899_s3 }
 0x2ff   :  { %v330_v33 = vpop.permute.xlu1 %329 }
 0x300   :  { %1532 = vmatmul.mubr.msk.f32.vlgmr.msra.gmra.mrb[2].mxu1 %vm228_vm2, %v330_v33 }
 0x301   :  { %1666 = vmatpush3.bf16.msra.mxu1 %v2022_v8  ;;  %1553 = vmatprep.mubr.msk.f32.mxu1 %vm1896_vm0, %v1897_v1 }
 0x302   :  { %1667 = vmatprep.subr.bf16.mxu1 %v1895_v0 }
 0x305   :  { %1669 = vmatpush3.bf16.msra.mxu1 %v2035_v12 }
 0x306   :  { %1676 = vmatprep.subr.bf16.mxu1 %v1895_v0 }
 0x3d3   :  { %v399_v35 = vpop.f32.mrb[2].mxu1 }
 0x3d4   :  { %v403_v36 = vadd.f32 %v399_v35, %v191_v34  ;;  %v1533_v37 = vpop.f32.mrb[3].mxu1 }
 0x3d6   :  { %1736 = vtanh.f32 %v403_v36  ;;  %v1407_v39 = vmul.f32 -1.442695, %v403_v36 }
 0x3d8   :  { %1738 = vpow2.f32 %v1407_v39 }
 0x3e0   :  { %v1737_v38 = vpop.eup %1736 }
 0x3e1   :  { %413 = vrot.lane.b32.xlu0 %v1737_v38, %s1898_s21 }
 0x3e2   :  { %v1739_v40 = vpop.eup %1738 }
 0x3e3   :  { %v407_v41 = vadd.f32 1.0, %v1739_v40 }
 0x3e5   :  { %1740 = vrcp.f32 %v407_v41 }
 0x3ef   :  { %v1741_v42 = vpop.eup %1740 }
 0x3f0   :  { %v411_v45 = vmul.f32 %v1741_v42, %v320_v29 }
 0x453   :  { %v414_v43 = vpop.permute.xlu0 %413 }
 0x454   :  { %v416_v44 = vmul.f32 %v1741_v42, %v414_v43 }
 0x456   :  { %418 = vrot.lane.b32.xlu1 %v416_v44, %s1898_s21  ;;  %v206_v44 = vadd.f32 %v2056_v13, %v2106_v60 }
 0x4c8   :  { %v419_v46 = vpop.permute.xlu1 %418 }
 0x4c9   :  { %v421_v47 = vadd.f32 %v419_v46, %v411_v45 }
 0x4cb   :  { %1742 = vtanh.f32 %v421_v47 }
 0x4d5   :  { %v1743_v54 = vpop.eup %1742 }
 0x4d6   :  { %424 = vrot.lane.b32.xlu0 %v1743_v54, %s1898_s21 }
 0x548   :  { %v425_v55 = vpop.permute.xlu0 %424 }
 0x549   :  { %v427_v56 = vmul.f32 %v1741_v42, %v425_v55 }
 0x54b   :  { %430 = vrot.lane.b32.xlu1 %v427_v56, %s1899_s3  ;;  %v428_v21 = vadd.f32 %v427_v56, %v2062_v32 }
 0x5bd   :  { %v431_v63 = vpop.permute.xlu1 %430 }
 0x5be   :  { %1543 = vmatmul.mubr.msk.f32.vlgmr.msra.gmra.mrb[8].mxu0 %vm228_vm2, %v431_v63 }
 0x5bf   :  { %1672 = vmatpush3.bf16.msra.mxu0 %v2022_v8  ;;  %1564 = vmatprep.mubr.msk.f32.mxu0 %vm1896_vm0, %v1897_v1 }
 0x5c0   :  { %1673 = vmatprep.subr.bf16.mxu0 %v1895_v0 }
 0x5c3   :  { %1675 = vmatpush3.bf16.msra.mxu0 %v2035_v12 }
 0x5c4   :  { %1682 = vmatprep.subr.bf16.mxu0 %v1895_v0 }
 0x691   :  { %v500_v3 = vpop.f32.mrb[8].mxu0 }
 0x692   :  { %v504_v4 = vadd.f32 %v500_v3, %v196_v2  ;;  %v1544_v5 = vpop.f32.mrb[9].mxu0 }
 0x694   :  { %1744 = vtanh.f32 %v504_v4  ;;  %v1409_v7 = vmul.f32 -1.442695, %v504_v4  ;;  %v211_v4 = vadd.f32 %v2104_v59, %v2056_v13 }
 0x696   :  { %1746 = vpow2.f32 %v1409_v7 }
 0x69e   :  { %v1745_v6 = vpop.eup %1744 }
 0x69f   :  { %514 = vrot.lane.b32.xlu0 %v1745_v6, %s1898_s21 }
 0x6a0   :  { %v1747_v9 = vpop.eup %1746 }
 0x6a1   :  { %v508_v10 = vadd.f32 1.0, %v1747_v9 }
 0x6a3   :  { %1748 = vrcp.f32 %v508_v10 }
 0x6ad   :  { %v1749_v11 = vpop.eup %1748 }
 0x6ae   :  { %v512_v16 = vmul.f32 %v1749_v11, %v421_v47 }
 0x711   :  { %v515_v14 = vpop.permute.xlu0 %514 }
 0x712   :  { %v517_v15 = vmul.f32 %v1749_v11, %v515_v14 }
 0x714   :  { %519 = vrot.lane.b32.xlu1 %v517_v15, %s1898_s21 }
 0x786   :  { %v520_v17 = vpop.permute.xlu1 %519 }
 0x787   :  { %v522_v18 = vadd.f32 %v520_v17, %v512_v16 }
 0x789   :  { %1750 = vtanh.f32 %v522_v18 }
 0x793   :  { %v1751_v19 = vpop.eup %1750 }
 0x794   :  { %525 = vrot.lane.b32.xlu0 %v1751_v19, %s1898_s21 }
 0x806   :  { %v526_v20 = vpop.permute.xlu0 %525 }
 0x807   :  { %v528_v22 = vmul.f32 %v1749_v11, %v526_v20 }
 0x809   :  { %v529_v23 = vadd.f32 %v528_v22, %v428_v21  ;;  %531 = vrot.lane.b32.xlu1 %v528_v22, %s1899_s3 }
 0x87b   :  { %v532_v24 = vpop.permute.xlu1 %531 }
 0x87c   :  { %1554 = vmatmul.mubr.msk.f32.vlgmr.msra.gmra.mrb[4].mxu1 %vm228_vm2, %v532_v24 }
 0x87d   :  { %1678 = vmatpush3.bf16.msra.mxu1 %v2022_v8  ;;  %1575 = vmatprep.mubr.msk.f32.mxu1 %vm1896_vm0, %v1897_v1 }
 0x87e   :  { %1679 = vmatprep.subr.bf16.mxu1 %v1895_v0 }
 0x881   :  { %1681 = vmatpush3.bf16.msra.mxu1 %v2035_v12 }
 0x882   :  { %1688 = vmatprep.subr.bf16.mxu1 %v1895_v0 }
 0x94f   :  { %v601_v26 = vpop.f32.mrb[4].mxu1 }
 0x950   :  { %v605_v27 = vadd.f32 %v601_v26, %v201_v25  ;;  %v1555_v28 = vpop.f32.mrb[5].mxu1 }
 0x952   :  { %1752 = vtanh.f32 %v605_v27  ;;  %v1411_v30 = vmul.f32 -1.442695, %v605_v27 }
 0x954   :  { %1754 = vpow2.f32 %v1411_v30 }
 0x95c   :  { %v1753_v29 = vpop.eup %1752 }
 0x95d   :  { %615 = vrot.lane.b32.xlu0 %v1753_v29, %s1898_s21 }
 0x95e   :  { %v1755_v31 = vpop.eup %1754 }
 0x95f   :  { %v609_v32 = vadd.f32 1.0, %v1755_v31 }
 0x961   :  { %1756 = vrcp.f32 %v609_v32 }
 0x96b   :  { %v1757_v33 = vpop.eup %1756 }
 0x96c   :  { %v613_v36 = vmul.f32 %v1757_v33, %v522_v18 }
 0x9cf   :  { %v616_v34 = vpop.permute.xlu0 %615 }
 0x9d0   :  { %v618_v35 = vmul.f32 %v1757_v33, %v616_v34 }
 0x9d2   :  { %620 = vrot.lane.b32.xlu1 %v618_v35, %s1898_s21 }
 0xa44   :  { %v621_v37 = vpop.permute.xlu1 %620 }
 0xa45   :  { %v623_v38 = vadd.f32 %v621_v37, %v613_v36 }
 0xa47   :  { %1758 = vtanh.f32 %v623_v38 }
 0xa51   :  { %v1759_v39 = vpop.eup %1758 }
 0xa52   :  { %626 = vrot.lane.b32.xlu0 %v1759_v39, %s1898_s21 }
 0xac4   :  { %v627_v40 = vpop.permute.xlu0 %626 }
 0xac5   :  { %v629_v41 = vmul.f32 %v1757_v33, %v627_v40 }
 0xac7   :  { %v630_v42 = vadd.f32 %v629_v41, %v529_v23  ;;  %632 = vrot.lane.b32.xlu1 %v629_v41, %s1899_s3  ;;  %v216_v23 = vadd.f32 %v2056_v13, %v2110_v62  ;;  %v221_v41 = vadd.f32 %v2108_v61, %v2056_v13  ;;  %v1036_v61 = vld [vmem:[%s2242_s4] sm:$0xff] }
 0xb39   :  { %v633_v43 = vpop.permute.xlu1 %632 }
 0xb3a   :  { %1565 = vmatmul.mubr.msk.f32.vlgmr.msra.gmra.mrb[10].mxu0 %vm228_vm2, %v633_v43 }
 0xb3b   :  { %1684 = vmatpush3.bf16.msra.mxu0 %v2022_v8  ;;  %1586 = vmatprep.mubr.msk.f32.mxu0 %vm1896_vm0, %v1897_v1 }
 0xb3c   :  { %1685 = vmatprep.subr.bf16.mxu0 %v1895_v0 }
 0xb3f   :  { %1687 = vmatpush3.bf16.msra.mxu0 %v2035_v12 }
 0xb40   :  { %1694 = vmatprep.subr.bf16.mxu0 %v1895_v0 }
 0xc0d   :  { %v702_v45 = vpop.f32.mrb[10].mxu0 }
 0xc0e   :  { %v706_v46 = vadd.f32 %v702_v45, %v206_v44  ;;  %v1566_v47 = vpop.f32.mrb[11].mxu0 }
 0xc10   :  { %1760 = vtanh.f32 %v706_v46  ;;  %v1413_v49 = vmul.f32 -1.442695, %v706_v46 }
 0xc12   :  { %1762 = vpow2.f32 %v1413_v49 }
 0xc1a   :  { %v1761_v48 = vpop.eup %1760 }
 0xc1b   :  { %716 = vrot.lane.b32.xlu0 %v1761_v48, %s1898_s21 }
 0xc1c   :  { %v1763_v50 = vpop.eup %1762 }
 0xc1d   :  { %v710_v51 = vadd.f32 1.0, %v1763_v50 }
 0xc1f   :  { %1764 = vrcp.f32 %v710_v51 }
 0xc29   :  { %v1765_v52 = vpop.eup %1764 }
 0xc2a   :  { %v714_v55 = vmul.f32 %v1765_v52, %v623_v38 }
 0xc8d   :  { %v717_v53 = vpop.permute.xlu0 %716 }
 0xc8e   :  { %v719_v54 = vmul.f32 %v1765_v52, %v717_v53 }
 0xc90   :  { %721 = vrot.lane.b32.xlu1 %v719_v54, %s1898_s21  ;;  %v1037_v54 = vld [vmem:[%s2242_s4 + $0x8] sm:$0xff] }
 0xd02   :  { %v722_v56 = vpop.permute.xlu1 %721 }
 0xd03   :  { %v724_v57 = vadd.f32 %v722_v56, %v714_v55  ;;  %v1127_v55 = vld [vmem:[#allocation5] sm:$0xff]  ;;  %v1695_v56 = vpack.c.bf16 %v1037_v54, %v1036_v61 }
 0xd05   :  { %1766 = vtanh.f32 %v724_v57 }
 0xd0f   :  { %v1767_v58 = vpop.eup %1766 }
 0xd10   :  { %727 = vrot.lane.b32.xlu0 %v1767_v58, %s1898_s21  ;;  %v1038_v58 = vld [vmem:[%s2242_s4 + $0x10] sm:$0xff] }
 0xd82   :  { %v728_v60 = vpop.permute.xlu0 %727 }
 0xd83   :  { %v730_v63 = vmul.f32 %v1765_v52, %v728_v60  ;;  %v1039_v60 = vld [vmem:[%s2242_s4 + $0x18] sm:$0xff] }
 0xd85   :  { %v731_v2 = vadd.f32 %v730_v63, %v630_v42  ;;  %733 = vrot.lane.b32.xlu1 %v730_v63, %s1899_s3 }
 0xdf7   :  { %v734_v3 = vpop.permute.xlu1 %733 }
 0xdf8   :  { %1576 = vmatmul.mubr.msk.f32.vlgmr.msra.gmra.mrb[6].mxu1 %vm228_vm2, %v734_v3  ;;  %v1130_v3 = vld [vmem:[#allocation5 + $0x18] sm:$0xff] }
 0xdf9   :  { %1690 = vmatpush3.bf16.msra.mxu1 %v2022_v8  ;;  %1597 = vmatprep.mubr.msk.f32.mxu1 %vm1896_vm0, %v1897_v1 }
 0xdfa   :  { %1691 = vmatprep.subr.bf16.mxu1 %v1895_v0 }
 0xdfd   :  { %1693 = vmatpush3.bf16.msra.mxu1 %v2035_v12 }
 0xdfe   :  { %1700 = vmatprep.subr.bf16.mxu1 %v1895_v0 }
 0xecb   :  { %v803_v5 = vpop.f32.mrb[6].mxu1 }
 0xecc   :  { %v807_v6 = vadd.f32 %v803_v5, %v211_v4  ;;  %v1577_v7 = vpop.f32.mrb[7].mxu1  ;;  %v1698_v4 = vpack.c.bf16 %v1039_v60, %v1038_v58 }
 0xece   :  { %1768 = vtanh.f32 %v807_v6  ;;  %v1415_v8 = vmul.f32 -1.442695, %v807_v6 }
 0xed0   :  { %1770 = vpow2.f32 %v1415_v8 }
 0xed8   :  { %v1769_v9 = vpop.eup %1768 }
 0xed9   :  { %817 = vrot.lane.b32.xlu0 %v1769_v9, %s1898_s21 }
 0xeda   :  { %v1771_v10 = vpop.eup %1770 }
 0xedb   :  { %v811_v11 = vadd.f32 1.0, %v1771_v10 }
 0xedd   :  { %1772 = vrcp.f32 %v811_v11  ;;  %v1123_v11 = vld [vmem:[%s2244_s6] sm:$0xff] }
 0xee7   :  { %v1773_v14 = vpop.eup %1772 }
 0xee8   :  { %v815_v16 = vmul.f32 %v1773_v14, %v724_v57  ;;  %v1128_v57 = vld [vmem:[#allocation5 + $0x8] sm:$0xff] }
 0xee9   :  { %v1701_v63 = vpack.c.bf16 %v1128_v57, %v1127_v55 }
 0xf4b   :  { %v818_v15 = vpop.permute.xlu0 %817 }
 0xf4c   :  { %v820_v12 = vmul.f32 %v1773_v14, %v818_v15 }
 0xf4e   :  { %822 = vrot.lane.b32.xlu1 %v820_v12, %s1898_s21 }
 0xfc0   :  { %v823_v17 = vpop.permute.xlu1 %822 }
 0xfc1   :  { %v825_v59 = vadd.f32 %v823_v17, %v815_v16  ;;  %v1125_v16 = vld [vmem:[%s2244_s6 + $0x10] sm:$0xff]  ;;  %v1126_v17 = vld [vmem:[%s2244_s6 + $0x18] sm:$0xff] }
 0xfc3   :  { %1774 = vtanh.f32 %v825_v59 }
 0xfcd   :  { %v1775_v18 = vpop.eup %1774 }
 0xfce   :  { %828 = vrot.lane.b32.xlu0 %v1775_v18, %s1898_s21  ;;  %v1420_v18 = vld [vmem:[%s2243_s5] ss:$0 sm:$0xff]  ;;  %s1900_s5 = smov 116  }
0x1040   :  { %v829_v19 = vpop.permute.xlu0 %828 }
0x1041   :  { %v831_v20 = vmul.f32 %v1773_v14, %v829_v19  ;;  %v1124_v14 = vld [vmem:[%s2244_s6 + $0x8] sm:$0xff]  ;;  %s1901_s6 = smov 12  }
0x1042   :  { %v1707_v15 = vpack.c.bf16 %v1124_v14, %v1123_v11 }
0x1043   :  { %v832_v21 = vadd.f32 %v831_v20, %v731_v2  ;;  %834 = vrot.lane.b32.xlu1 %v831_v20, %s1899_s3  ;;  %v1129_v2 = vld [vmem:[#allocation5 + $0x10] sm:$0xff] }
0x1044   :  { %v1704_v5 = vpack.c.bf16 %v1130_v3, %v1129_v2 }
0x10b5   :  { %v835_v22 = vpop.permute.xlu1 %834 }
0x10b6   :  { %1587 = vmatmul.mubr.msk.f32.vlgmr.msra.gmra.mrb[12].mxu0 %vm228_vm2, %v835_v22 }
0x10b7   :  { %1608 = vmatprep.mubr.msk.f32.mxu0 %vm1896_vm0, %v1897_v1  ;;  %1696 = vmatpush3.bf16.msra.mxu0 %v1695_v56 }
0x10b8   :  { %1697 = vmatprep.subr.bf16.mxu0 %v1895_v0 }
0x10bb   :  { %1699 = vmatpush3.bf16.msra.mxu0 %v1698_v4 }
0x10bc   :  { %1706 = vmatprep.subr.bf16.mxu0 %v1895_v0 }
0x1189   :  { %v904_v24 = vpop.f32.mrb[12].mxu0 }
0x118a   :  { %v908_v25 = vadd.f32 %v904_v24, %v216_v23  ;;  %v1588_v26 = vpop.f32.mrb[13].mxu0 }
0x118c   :  { %1776 = vtanh.f32 %v908_v25  ;;  %v1417_v28 = vmul.f32 -1.442695, %v908_v25  ;;  %v1424_v25 = vld [vmem:[%s2246_s8] ss:$0 sm:$0xff]  ;;  %s1902_s8 = smov [#allocation8]  }
0x118d   :  { %s1386_s29 = sshll.u32 %s1902_s8, 4  ;;  %s1387_s29 = int_to_ptr.vmem [resolvable:$true] %s1386_s29 }
0x118e   :  { %1778 = vpow2.f32 %v1417_v28  ;;  %s1862_s30 = scalar_lea.vmem %s1387_s29, 128  ;;  %p1867_p11 = scmp.lt.s32.totalorder %s1387_s29, %s1387_s29 }
0x118f   :  { %p1863_p10 = scmp.ne.s32.totalorder %s1387_s29, %s1862_s30  ;;  %p1868_p12 = scmp.lt.s32.totalorder %s1862_s30, %s1862_s30 }
0x1191   :  { %p1869_p13 = por %p1868_p12, %p1867_p11 }
0x1193   :  { %p1870_p0 = pnand %p1869_p13, %p1863_p10 }
0x1196   :  { %v1777_v27 = vpop.eup %1776 }
0x1197   :  { %918 = vrot.lane.b32.xlu0 %v1777_v27, %s1898_s21 }
0x1198   :  { %v1779_v29 = vpop.eup %1778 }
0x1199   :  { %v912_v30 = vadd.f32 1.0, %v1779_v29 }
0x119b   :  { %1780 = vrcp.f32 %v912_v30  ;;  %v1289_v30 = vld [vmem:[#allocation7] sm:$0xff] }
0x11a5   :  { %v1781_v31 = vpop.eup %1780 }
0x11a6   :  { %v916_v34 = vmul.f32 %v1781_v31, %v825_v59  ;;  %v1710_v59 = vpack.c.bf16 %v1126_v17, %v1125_v16 }
0x1209   :  { %v919_v32 = vpop.permute.xlu0 %918 }
0x120a   :  { %v921_v33 = vmul.f32 %v1781_v31, %v919_v32 }
0x120c   :  { %923 = vrot.lane.b32.xlu1 %v921_v33, %s1898_s21  ;;  %v1291_v33 = vld [vmem:[#allocation7 + $0x10] sm:$0xf] }
0x127e   :  { %v924_v35 = vpop.permute.xlu1 %923 }
0x127f   :  { %v926_v62 = vadd.f32 %v924_v35, %v916_v34 }
0x1281   :  { %1782 = vtanh.f32 %v926_v62 }
0x128b   :  { %v1783_v36 = vpop.eup %1782 }
0x128c   :  { %929 = vrot.lane.b32.xlu0 %v1783_v36, %s1898_s21 }
0x12fe   :  { %v930_v37 = vpop.permute.xlu0 %929 }
0x12ff   :  { %v932_v38 = vmul.f32 %v1781_v31, %v930_v37  ;;  %v1290_v31 = vld [vmem:[#allocation7 + $0x8] sm:$0xff] }
0x1300   :  { %v1713_v32 = vpack.c.bf16 %v1290_v31, %v1289_v30 }
0x1301   :  { %v933_v39 = vadd.f32 %v932_v38, %v832_v21  ;;  %935 = vrot.lane.b32.xlu1 %v932_v38, %s1899_s3 }
0x1373   :  { %v936_v40 = vpop.permute.xlu1 %935 }
0x1374   :  { %1598 = vmatmul.mubr.msk.f32.vlgmr.msra.gmra.mrb[8].mxu1 %vm228_vm2, %v936_v40 }
0x1375   :  { %1619 = vmatprep.mubr.msk.f32.mxu1 %vm1896_vm0, %v1897_v1  ;;  %1702 = vmatpush3.bf16.msra.mxu1 %v1701_v63 }
0x1376   :  { %1703 = vmatprep.subr.bf16.mxu1 %v1895_v0 }
0x1379   :  { %1705 = vmatpush3.bf16.msra.mxu1 %v1704_v5 }
0x137a   :  { %1712 = vmatprep.subr.bf16.mxu1 %v1895_v0 }
0x1447   :  { %v1005_v42 = vpop.f32.mrb[8].mxu1 }
0x1448   :  { %v1009_v43 = vadd.f32 %v1005_v42, %v221_v41  ;;  %v1599_v44 = vpop.f32.mrb[9].mxu1 }
0x144a   :  { %1784 = vtanh.f32 %v1009_v43  ;;  %v1419_v46 = vmul.f32 -1.442695, %v1009_v43 }
0x144c   :  { %1786 = vpow2.f32 %v1419_v46 }
0x1454   :  { %v1785_v45 = vpop.eup %1784 }
0x1455   :  { %1019 = vrot.lane.b32.xlu0 %v1785_v45, %s1898_s21 }
0x1456   :  { %v1787_v47 = vpop.eup %1786 }
0x1457   :  { %v1013_v48 = vadd.f32 1.0, %v1787_v47 }
0x1459   :  { %1788 = vrcp.f32 %v1013_v48 }
0x1463   :  { %v1789_v49 = vpop.eup %1788 }
0x1464   :  { %v1017_v52 = vmul.f32 %v1789_v49, %v926_v62 }
0x14c7   :  { %v1020_v50 = vpop.permute.xlu0 %1019 }
0x14c8   :  { %v1022_v51 = vmul.f32 %v1789_v49, %v1020_v50 }
0x14ca   :  { %1024 = vrot.lane.b32.xlu1 %v1022_v51, %s1898_s21 }
0x153c   :  { %v1025_v53 = vpop.permute.xlu1 %1024 }
0x153d   :  { %v1027_v13 = vadd.f32 %v1025_v53, %v1017_v52 }
0x153f   :  { %1790 = vtanh.f32 %v1027_v13 }
0x1549   :  { %v1791_v6 = vpop.eup %1790 }
0x154a   :  { %1030 = vrot.lane.b32.xlu0 %v1791_v6, %s1898_s21 }
0x15bc   :  { %v1031_v7 = vpop.permute.xlu0 %1030 }
0x15bd   :  { %v1033_v9 = vmul.f32 %v1789_v49, %v1031_v7 }
0x15bf   :  { %v1034_v8 = vadd.f32 %v1033_v9, %v933_v39 }
0x15c1   :  { %v1035_v10 = vmul.f32 0.125, %v1034_v8 }
0x15c3   :  { %1048 = vrot.lane.b32.xlu1 %v1035_v10, %s1899_s3 }
0x1635   :  { %v1049_v12 = vpop.permute.xlu1 %1048 }
0x1636   :  { %1609 = vmatmul.mubr.msk.f32.vlgmr.msra.gmra.mrb[14].mxu0 %vm228_vm2, %v1049_v12  ;;  %1620 = vmatmul.mubr.msk.f32.vlgmr.msra.gmra.mrb[10].mxu1 %vm228_vm2, %v1049_v12 }
0x1637   :  { %1708 = vmatpush3.bf16.msra.mxu0 %v1707_v15  ;;  %1630 = vmatprep.mubr.msk.f32.mxu0 %vm1896_vm0, %v1897_v1 }
0x1638   :  { %1709 = vmatprep.subr.bf16.mxu0 %v1895_v0  ;;  %1639 = vmatprep.mubr.msk.f32.mxu1 %vm1896_vm0, %v1897_v1 }
0x1639   :  { %1714 = vmatpush3.bf16.msra.mxu1 %v1713_v32 }
0x163a   :  { %1637 = vmatprep.subr.mxu1 %v1897_v1 }
0x163b   :  { %1711 = vmatpush3.bf16.msra.mxu0 %v1710_v59 }
0x163d   :  { %1638 = vmatpush3.msk.msra.mxu1 %vm1298_vm4, %v1291_v33 }
0x1709   :  { %v1118_v19 = vpop.f32.mrb[14].mxu0  ;;  %v1197_v20 = vpop.f32.mrb[10].mxu1 }
0x170a   :  { %v1119_v0 = vadd.f32 %v1420_v18, %v1118_v19  ;;  %v1610_v21 = vpop.f32.mrb[15].mxu0  ;;  %v1621_v22 = vpop.f32.mrb[11].mxu1 }
0x170c   :  { %v1122_v23 = vmax.f32 %v1119_v0, 0.0 }
0x170e   :  { %1631 = vmatmul.mubr.msk.f32.vlgmr.msra.gmra.mrb[16].mxu0 %vm228_vm2, %v1122_v23 }
0x17e1   :  { %v1270_v24 = vpop.f32.mrb[16].mxu0 }
0x17e2   :  { %v1271_v26 = vadd.f32 %v1270_v24, %v1197_v20  ;;  %v1632_v27 = vpop.f32.mrb[17].mxu0 }
0x17e4   :  { %v1281_v28 = vadd.f32 %v1424_v25, %v1271_v26 }
0x17e6   :  { %1378 = vst [vmem:[#allocation8] sm:$0xff] %v1281_v28  ;;  %v1283_v29 = vsel %vm1282_vm3, %v1281_v28, -inf }
0x17e7   :  { %1284 = vmax.xlane.f32.xlu0 %v1283_v29 }
0x1874   :  { %v1285_v34 = vpop.xlane.xlu0 %1284 }
0x1875   :  { %v1286_v35 = vsub.f32 %v1281_v28, %v1285_v34 }
0x1877   :  { %v1287_v62 = vmul.f32 1.442695, %v1286_v35 }
0x1879   :  { %1792 = vpow2.f32 %v1287_v62 }
0x1883   :  { %v1793_v36 = vpop.eup %1792 }
0x1884   :  { %1293 = vrot.lane.b32.xlu1 %v1793_v36, %s1900_s5 }
0x18f6   :  { %v1294_v37 = vpop.permute.xlu1 %1293 }
0x18f7   :  { %1640 = vmatmul.mubr.msk.f32.vlgmr.msra.gmra.mrb[12].mxu1 %vm1295_vm5, %v1294_v37 }
0x19ca   :  { %v1368_v38 = vpop.f32.mrb[12].mxu1 }
0x19cb   :  { %1794 = vrcp.f32 %v1368_v38  ;;  %v1641_v39 = vpop.f32.mrb[13].mxu1 }
0x19d5   :  { %v1795_v40 = vpop.eup %1794 }
0x19d6   :  { %1374 = vrot.lane.b32.xlu1 %v1795_v40, %s1901_s6 }
0x1a48   :  { %v1375_v1 = vpop.permute.xlu1 %1374 }
0x1a49   :  { %v1377_v41 = vmul.f32 %v1793_v36, %v1375_v1 }
0x1a4b   :  { %1379 = vst.msk [vmem:[#allocation8] sm:$0xff] %vm1282_vm3, %v1377_v41 }
0x1a4c   :  { %1873 = shalt.err (!%p1870_p0)
}
0x1a4d   :  { %s1874_s11 = scalar_lea.hbm %s2248_s10, 128 }
0x1a4e   :  { %p1875_p1 = scmp.ne.s32.totalorder %s2248_s10, %s1874_s11  ;;  %p1878_p2 = scmp.lt.u32.totalorder %s1874_s11, %s2248_s10 }
0x1a50   :  { %p1880_p3 = pnand %p1878_p2, %p1875_p1 }
0x1a52   :  { %1883 = shalt.err (!%p1880_p3)
}
0x1a53   :  { %1389 = dma.vmem_to_hbm [thread:$0]  %s1387_s29, 128, %s2248_s10, [#allocation4]  }
0x1a54   :  { %1888 = dma.done.wait [#allocation4], 128  }
0x1a55   :  { %1889 = vsyncadd [#allocation4], 4294967168 }
0x1a56   :  { %1393 = vsyncpa [#allocation3], 1 }
0x1a57   :  { %1394 = vsyncpa [#allocation6], 1 }
0x1a58   :  { %1395 = vsyncpa [#allocation4], 1 }

</bundles_post_ra>
